<compile_context>
chip_gen: v6e
topology: v6e:2x2x1
jax: 0.10.0
libtpu: 0.0.40
codegen_flags: <defaults>
</compile_context>

<pallas_src>
import functools
import math

import jax
import jax.numpy as jnp
from jax import lax
from jax.experimental import pallas as pl
from jax.experimental.pallas import tpu as pltpu


def _embed_block_kernel(seed_ref, ids_ref, emb_hbm, pe_ref, out_ref,
                        gather_buf, copy_sems,
                        *, block_rows, seq_len, vocab_size, drop_rate):
    """seed_ref : SMEM (1,) int32          (scalar prefetch)
       ids_ref  : SMEM (B, S) int32        (scalar prefetch, drives the gather)
       emb_hbm  : HBM  (V, D) float32      (memory_space=pl.ANY, gathered by DMA)
       pe_ref   : VMEM (TS, D) float32     (positional-encoding tile for this seq block)
       out_ref  : VMEM (1, TS, D) float32
       gather_buf : VMEM (TS, D) float32   scratch for the gathered embedding rows
       copy_sems  : DMA semaphores (TS,)
    """
    b = pl.program_id(0)
    t = pl.program_id(1)
    TS, D = gather_buf.shape

    # ---- gather: one async DMA per row from the HBM-resident table ----------
    # TODO(synk): PyTorch nn.Embedding raises on out-of-range ids; here they are clamped.
    for r in range(block_rows):
        tok = ids_ref[b, t * block_rows + r]
        tok = jnp.clip(tok, 0, vocab_size - 1)
        pltpu.make_async_copy(emb_hbm.at[tok], gather_buf.at[r],
                              copy_sems.at[r]).start()
    for r in range(block_rows):
        pltpu.make_async_copy(emb_hbm.at[0], gather_buf.at[r],
                              copy_sems.at[r]).wait()

    # ---- positional-encoding add (VPU) ---------------------------------------
    x = gather_buf[...] + pe_ref[...]

    # ---- dropout (training semantics, deterministic) -------------------------
    if drop_rate > 0.0:
        seed = seed_ref[0].astype(jnp.uint32)
        # Global element index -> unique counter per element, so every grid
        # block gets an independent mask without re-seeding hardware PRNG.
        row0 = b * seq_len + t * block_rows
        rows = row0 + lax.broadcasted_iota(jnp.int32, (TS, D), 0)
        cols = lax.broadcasted_iota(jnp.int32, (TS, D), 1)
        ctr = (rows * D + cols).astype(jnp.uint32)

        # splitmix32-style hash of (counter, seed)
        h = ctr * jnp.uint32(0x9E3779B9) + seed * jnp.uint32(0x85EBCA6B)
        h = h ^ (h >> 16)
        h = h * jnp.uint32(0x7FEB352D)
        h = h ^ (h >> 15)
        h = h * jnp.uint32(0x846CA68B)
        h = h ^ (h >> 16)

        # Integer-domain compare (no float convert / multiply needed).
        threshold = jnp.uint32(int(drop_rate * (1 << 24)))
        keep = (h >> 8) >= threshold
        scale = jnp.float32(1.0 / (1.0 - drop_rate))
        x = jnp.where(keep, x * scale, jnp.float32(0.0))

    out_ref[0] = x.astype(out_ref.dtype)


def sinusoidal_positional_encoding(max_len, d_model):
    pos = jnp.arange(max_len, dtype=jnp.float32)[:, None]
    div = jnp.exp(jnp.arange(0, d_model, 2, dtype=jnp.float32)
                  * (-math.log(10000.0) / d_model))
    pe = jnp.zeros((max_len, d_model), dtype=jnp.float32)
    pe = pe.at[:, 0::2].set(jnp.sin(pos * div))
    pe = pe.at[:, 1::2].set(jnp.cos(pos * div))
    return pe


def transformer_embedding(tokens, emb_table, pe_table, *, drop_rate, seed,
                          block_rows=8):
    """tokens: int32 [B, S]; emb_table: [V, D]; pe_table: [max_len, D].
       Returns float32 [B, S, D] (embedding lookup + PE add + dropout)."""
    B, S = tokens.shape
    V, D = emb_table.shape
    assert pe_table.shape[0] >= S and pe_table.shape[1] == D
    assert S % block_rows == 0, "seq length must be divisible by block_rows"

    pe = pe_table[:S]                              # (S, D); streamed per seq tile
    ids = tokens.astype(jnp.int32)                 # (B, S) -> SMEM scalar prefetch
    seed_arr = jnp.array([seed], dtype=jnp.int32)

    kernel = functools.partial(
        _embed_block_kernel,
        block_rows=block_rows, seq_len=S, vocab_size=V,
        drop_rate=float(drop_rate))

    out = pl.pallas_call(
        kernel,
        out_shape=jax.ShapeDtypeStruct((B, S, D), jnp.float32),
        grid_spec=pltpu.PrefetchScalarGridSpec(
            num_scalar_prefetch=2,                 # seed, ids
            grid=(B, S // block_rows),
            in_specs=[
                # embedding table: stays in HBM, gathered by manual DMA
                pl.BlockSpec(memory_space=pl.ANY),
                # PE tile: depends only on the seq-tile index -> re-used per batch
                pl.BlockSpec((block_rows, D), lambda b, t, seed, ids: (t, 0)),
            ],
            out_specs=pl.BlockSpec((1, block_rows, D),
                                   lambda b, t, seed, ids: (b, t, 0)),
            scratch_shapes=[
                pltpu.VMEM((block_rows, D), jnp.float32),   # gathered rows
                pltpu.SemaphoreType.DMA((block_rows,)),     # per-row copy sems
            ],
        ),
        compiler_params=pltpu.CompilerParams(
            dimension_semantics=("parallel", "parallel")),
    )(seed_arr, ids, emb_table, pe)

    return out


if __name__ == "__main__":
    # Small, deterministic configuration.
    B, S = 2, 8            # batch, sequence length
    V, D = 32, 128         # vocab size, model dim (lane-aligned)
    MAX_LEN = 16
    DR_RATE = 0.1

    key = jax.random.PRNGKey(0)
    k_tok, k_emb = jax.random.split(key)

    tokens = jax.random.randint(k_tok, (B, S), 0, V, dtype=jnp.int32)
    emb_table = jax.random.normal(k_emb, (V, D), dtype=jnp.float32)  # nn.Embedding ~ N(0,1)
    pe_table = sinusoidal_positional_encoding(MAX_LEN, D)

    out = transformer_embedding(tokens, emb_table, pe_table,
                                drop_rate=DR_RATE, seed=0, block_rows=8)
    jax.block_until_ready(out)

    assert out.shape == (B, S, D) and out.dtype == jnp.float32

    # Self-check: every element is either dropped (exactly 0) or equals
    # (embedding + positional encoding) / (1 - p).
    ref = emb_table[tokens] + pe_table[:S][None, :, :]
    kept = jnp.isclose(out, ref / (1.0 - DR_RATE), rtol=1e-5, atol=1e-5)
    dropped = (out == 0.0)
    assert bool(jnp.all(kept | dropped))

    print("KERNEL_OK")
</pallas_src>

<mosaic_0001>
module attributes {stable_mosaic.version = 11 : i64} {
  func.func @_embed_block_kernel(%arg0: i32, %arg1: i32, %arg2: memref<1xi32, #tpu.memory_space<smem>>, %arg3: memref<2x8xi32, #tpu.memory_space<smem>>, %arg4: memref<32x128xf32, #tpu.memory_space<any>>, %arg5: memref<8x128xf32, #tpu.memory_space<vmem>>, %arg6: memref<1x8x128xf32, #tpu.memory_space<vmem>>, %arg7: memref<8x128xf32, #tpu.memory_space<vmem>>, %arg8: memref<8x!tpu.dma_semaphore, #tpu.memory_space<semaphore_mem>>) attributes {dimension_semantics = [#tpu.dimension_semantics<parallel>, #tpu.dimension_semantics<parallel>], iteration_bounds = array<i64: 2, 1>, scalar_prefetch = 2 : i64, scratch_operands = 2 : i64, tpu.core_type = #tpu.core_type<tc>, window_params = [{}, {transform_indices = @transform_1, window_bounds = array<i64: 8, 128>}, {transform_indices = @transform_2, window_bounds = array<i64: 1, 8, 128>}]} {
    %c8_i32 = arith.constant 8 : i32
    %0 = arith.muli %arg1, %c8_i32 : i32
    %c0_i32 = arith.constant 0 : i32
    %1 = arith.addi %0, %c0_i32 : i32
    %2 = arith.index_cast %arg0 : i32 to index
    %3 = arith.index_cast %1 : i32 to index
    %4 = memref.load %arg3[%2, %3] : memref<2x8xi32, #tpu.memory_space<smem>>
    %c0_i32_0 = arith.constant 0 : i32
    %c31_i32 = arith.constant 31 : i32
    %5 = arith.maxsi %c0_i32_0, %4 : i32
    %6 = arith.minsi %c31_i32, %5 : i32
    %c0_i32_1 = arith.constant 0 : i32
    %c0_i32_2 = arith.constant 0 : i32
    %c0_i32_3 = arith.constant 0 : i32
    %7 = tpu.memref_slice %arg4[%6, %c0_i32_3] : memref<32x128xf32, #tpu.memory_space<any>> -> memref<1x128xf32, #tpu.memory_space<any>>
    %8 = tpu.memref_squeeze %7 : memref<1x128xf32, #tpu.memory_space<any>> -> memref<128xf32, #tpu.memory_space<any>>
    %c0_i32_4 = arith.constant 0 : i32
    %9 = tpu.memref_slice %arg7[%c0_i32_1, %c0_i32_4] : memref<8x128xf32, #tpu.memory_space<vmem>> -> memref<1x128xf32, #tpu.memory_space<vmem>>
    %10 = tpu.memref_squeeze %9 : memref<1x128xf32, #tpu.memory_space<vmem>> -> memref<128xf32, #tpu.memory_space<vmem>>
    %11 = tpu.memref_slice %arg8[%c0_i32_2] : memref<8x!tpu.dma_semaphore, #tpu.memory_space<semaphore_mem>> -> memref<1x!tpu.dma_semaphore, #tpu.memory_space<semaphore_mem>>
    %12 = tpu.memref_squeeze %11 : memref<1x!tpu.dma_semaphore, #tpu.memory_space<semaphore_mem>> -> memref<!tpu.dma_semaphore, #tpu.memory_space<semaphore_mem>>
    tpu.enqueue_dma source(%8 : memref<128xf32, #tpu.memory_space<any>>) target(%10 : memref<128xf32, #tpu.memory_space<vmem>>) target_semaphore(%12 : memref<!tpu.dma_semaphore, #tpu.memory_space<semaphore_mem>>)
    %c8_i32_5 = arith.constant 8 : i32
    %13 = arith.muli %arg1, %c8_i32_5 : i32
    %c1_i32 = arith.constant 1 : i32
    %14 = arith.addi %13, %c1_i32 : i32
    %15 = arith.index_cast %arg0 : i32 to index
    %16 = arith.index_cast %14 : i32 to index
    %17 = memref.load %arg3[%15, %16] : memref<2x8xi32, #tpu.memory_space<smem>>
    %c0_i32_6 = arith.constant 0 : i32
    %c31_i32_7 = arith.constant 31 : i32
    %18 = arith.maxsi %c0_i32_6, %17 : i32
    %19 = arith.minsi %c31_i32_7, %18 : i32
    %c1_i32_8 = arith.constant 1 : i32
    %c1_i32_9 = arith.constant 1 : i32
    %c0_i32_10 = arith.constant 0 : i32
    %20 = tpu.memref_slice %arg4[%19, %c0_i32_10] : memref<32x128xf32, #tpu.memory_space<any>> -> memref<1x128xf32, #tpu.memory_space<any>>
    %21 = tpu.memref_squeeze %20 : memref<1x128xf32, #tpu.memory_space<any>> -> memref<128xf32, #tpu.memory_space<any>>
    %c0_i32_11 = arith.constant 0 : i32
    %22 = tpu.memref_slice %arg7[%c1_i32_8, %c0_i32_11] : memref<8x128xf32, #tpu.memory_space<vmem>> -> memref<1x128xf32, #tpu.memory_space<vmem>>
    %23 = tpu.memref_squeeze %22 : memref<1x128xf32, #tpu.memory_space<vmem>> -> memref<128xf32, #tpu.memory_space<vmem>>
    %24 = tpu.memref_slice %arg8[%c1_i32_9] : memref<8x!tpu.dma_semaphore, #tpu.memory_space<semaphore_mem>> -> memref<1x!tpu.dma_semaphore, #tpu.memory_space<semaphore_mem>>
    %25 = tpu.memref_squeeze %24 : memref<1x!tpu.dma_semaphore, #tpu.memory_space<semaphore_mem>> -> memref<!tpu.dma_semaphore, #tpu.memory_space<semaphore_mem>>
    tpu.enqueue_dma source(%21 : memref<128xf32, #tpu.memory_space<any>>) target(%23 : memref<128xf32, #tpu.memory_space<vmem>>) target_semaphore(%25 : memref<!tpu.dma_semaphore, #tpu.memory_space<semaphore_mem>>)
    %c8_i32_12 = arith.constant 8 : i32
    %26 = arith.muli %arg1, %c8_i32_12 : i32
    %c2_i32 = arith.constant 2 : i32
    %27 = arith.addi %26, %c2_i32 : i32
    %28 = arith.index_cast %arg0 : i32 to index
    %29 = arith.index_cast %27 : i32 to index
    %30 = memref.load %arg3[%28, %29] : memref<2x8xi32, #tpu.memory_space<smem>>
    %c0_i32_13 = arith.constant 0 : i32
    %c31_i32_14 = arith.constant 31 : i32
    %31 = arith.maxsi %c0_i32_13, %30 : i32
    %32 = arith.minsi %c31_i32_14, %31 : i32
    %c2_i32_15 = arith.constant 2 : i32
    %c2_i32_16 = arith.constant 2 : i32
    %c0_i32_17 = arith.constant 0 : i32
    %33 = tpu.memref_slice %arg4[%32, %c0_i32_17] : memref<32x128xf32, #tpu.memory_space<any>> -> memref<1x128xf32, #tpu.memory_space<any>>
    %34 = tpu.memref_squeeze %33 : memref<1x128xf32, #tpu.memory_space<any>> -> memref<128xf32, #tpu.memory_space<any>>
    %c0_i32_18 = arith.constant 0 : i32
    %35 = tpu.memref_slice %arg7[%c2_i32_15, %c0_i32_18] : memref<8x128xf32, #tpu.memory_space<vmem>> -> memref<1x128xf32, #tpu.memory_space<vmem>>
    %36 = tpu.memref_squeeze %35 : memref<1x128xf32, #tpu.memory_space<vmem>> -> memref<128xf32, #tpu.memory_space<vmem>>
    %37 = tpu.memref_slice %arg8[%c2_i32_16] : memref<8x!tpu.dma_semaphore, #tpu.memory_space<semaphore_mem>> -> memref<1x!tpu.dma_semaphore, #tpu.memory_space<semaphore_mem>>
    %38 = tpu.memref_squeeze %37 : memref<1x!tpu.dma_semaphore, #tpu.memory_space<semaphore_mem>> -> memref<!tpu.dma_semaphore, #tpu.memory_space<semaphore_mem>>
    tpu.enqueue_dma source(%34 : memref<128xf32, #tpu.memory_space<any>>) target(%36 : memref<128xf32, #tpu.memory_space<vmem>>) target_semaphore(%38 : memref<!tpu.dma_semaphore, #tpu.memory_space<semaphore_mem>>)
    %c8_i32_19 = arith.constant 8 : i32
    %39 = arith.muli %arg1, %c8_i32_19 : i32
    %c3_i32 = arith.constant 3 : i32
    %40 = arith.addi %39, %c3_i32 : i32
    %41 = arith.index_cast %arg0 : i32 to index
    %42 = arith.index_cast %40 : i32 to index
    %43 = memref.load %arg3[%41, %42] : memref<2x8xi32, #tpu.memory_space<smem>>
    %c0_i32_20 = arith.constant 0 : i32
    %c31_i32_21 = arith.constant 31 : i32
    %44 = arith.maxsi %c0_i32_20, %43 : i32
    %45 = arith.minsi %c31_i32_21, %44 : i32
    %c3_i32_22 = arith.constant 3 : i32
    %c3_i32_23 = arith.constant 3 : i32
    %c0_i32_24 = arith.constant 0 : i32
    %46 = tpu.memref_slice %arg4[%45, %c0_i32_24] : memref<32x128xf32, #tpu.memory_space<any>> -> memref<1x128xf32, #tpu.memory_space<any>>
    %47 = tpu.memref_squeeze %46 : memref<1x128xf32, #tpu.memory_space<any>> -> memref<128xf32, #tpu.memory_space<any>>
    %c0_i32_25 = arith.constant 0 : i32
    %48 = tpu.memref_slice %arg7[%c3_i32_22, %c0_i32_25] : memref<8x128xf32, #tpu.memory_space<vmem>> -> memref<1x128xf32, #tpu.memory_space<vmem>>
    %49 = tpu.memref_squeeze %48 : memref<1x128xf32, #tpu.memory_space<vmem>> -> memref<128xf32, #tpu.memory_space<vmem>>
    %50 = tpu.memref_slice %arg8[%c3_i32_23] : memref<8x!tpu.dma_semaphore, #tpu.memory_space<semaphore_mem>> -> memref<1x!tpu.dma_semaphore, #tpu.memory_space<semaphore_mem>>
    %51 = tpu.memref_squeeze %50 : memref<1x!tpu.dma_semaphore, #tpu.memory_space<semaphore_mem>> -> memref<!tpu.dma_semaphore, #tpu.memory_space<semaphore_mem>>
    tpu.enqueue_dma source(%47 : memref<128xf32, #tpu.memory_space<any>>) target(%49 : memref<128xf32, #tpu.memory_space<vmem>>) target_semaphore(%51 : memref<!tpu.dma_semaphore, #tpu.memory_space<semaphore_mem>>)
    %c8_i32_26 = arith.constant 8 : i32
    %52 = arith.muli %arg1, %c8_i32_26 : i32
    %c4_i32 = arith.constant 4 : i32
    %53 = arith.addi %52, %c4_i32 : i32
    %54 = arith.index_cast %arg0 : i32 to index
    %55 = arith.index_cast %53 : i32 to index
    %56 = memref.load %arg3[%54, %55] : memref<2x8xi32, #tpu.memory_space<smem>>
    %c0_i32_27 = arith.constant 0 : i32
    %c31_i32_28 = arith.constant 31 : i32
    %57 = arith.maxsi %c0_i32_27, %56 : i32
    %58 = arith.minsi %c31_i32_28, %57 : i32
    %c4_i32_29 = arith.constant 4 : i32
    %c4_i32_30 = arith.constant 4 : i32
    %c0_i32_31 = arith.constant 0 : i32
    %59 = tpu.memref_slice %arg4[%58, %c0_i32_31] : memref<32x128xf32, #tpu.memory_space<any>> -> memref<1x128xf32, #tpu.memory_space<any>>
    %60 = tpu.memref_squeeze %59 : memref<1x128xf32, #tpu.memory_space<any>> -> memref<128xf32, #tpu.memory_space<any>>
    %c0_i32_32 = arith.constant 0 : i32
    %61 = tpu.memref_slice %arg7[%c4_i32_29, %c0_i32_32] : memref<8x128xf32, #tpu.memory_space<vmem>> -> memref<1x128xf32, #tpu.memory_space<vmem>>
    %62 = tpu.memref_squeeze %61 : memref<1x128xf32, #tpu.memory_space<vmem>> -> memref<128xf32, #tpu.memory_space<vmem>>
    %63 = tpu.memref_slice %arg8[%c4_i32_30] : memref<8x!tpu.dma_semaphore, #tpu.memory_space<semaphore_mem>> -> memref<1x!tpu.dma_semaphore, #tpu.memory_space<semaphore_mem>>
    %64 = tpu.memref_squeeze %63 : memref<1x!tpu.dma_semaphore, #tpu.memory_space<semaphore_mem>> -> memref<!tpu.dma_semaphore, #tpu.memory_space<semaphore_mem>>
    tpu.enqueue_dma source(%60 : memref<128xf32, #tpu.memory_space<any>>) target(%62 : memref<128xf32, #tpu.memory_space<vmem>>) target_semaphore(%64 : memref<!tpu.dma_semaphore, #tpu.memory_space<semaphore_mem>>)
    %c8_i32_33 = arith.constant 8 : i32
    %65 = arith.muli %arg1, %c8_i32_33 : i32
    %c5_i32 = arith.constant 5 : i32
    %66 = arith.addi %65, %c5_i32 : i32
    %67 = arith.index_cast %arg0 : i32 to index
    %68 = arith.index_cast %66 : i32 to index
    %69 = memref.load %arg3[%67, %68] : memref<2x8xi32, #tpu.memory_space<smem>>
    %c0_i32_34 = arith.constant 0 : i32
    %c31_i32_35 = arith.constant 31 : i32
    %70 = arith.maxsi %c0_i32_34, %69 : i32
    %71 = arith.minsi %c31_i32_35, %70 : i32
    %c5_i32_36 = arith.constant 5 : i32
    %c5_i32_37 = arith.constant 5 : i32
    %c0_i32_38 = arith.constant 0 : i32
    %72 = tpu.memref_slice %arg4[%71, %c0_i32_38] : memref<32x128xf32, #tpu.memory_space<any>> -> memref<1x128xf32, #tpu.memory_space<any>>
    %73 = tpu.memref_squeeze %72 : memref<1x128xf32, #tpu.memory_space<any>> -> memref<128xf32, #tpu.memory_space<any>>
    %c0_i32_39 = arith.constant 0 : i32
    %74 = tpu.memref_slice %arg7[%c5_i32_36, %c0_i32_39] : memref<8x128xf32, #tpu.memory_space<vmem>> -> memref<1x128xf32, #tpu.memory_space<vmem>>
    %75 = tpu.memref_squeeze %74 : memref<1x128xf32, #tpu.memory_space<vmem>> -> memref<128xf32, #tpu.memory_space<vmem>>
    %76 = tpu.memref_slice %arg8[%c5_i32_37] : memref<8x!tpu.dma_semaphore, #tpu.memory_space<semaphore_mem>> -> memref<1x!tpu.dma_semaphore, #tpu.memory_space<semaphore_mem>>
    %77 = tpu.memref_squeeze %76 : memref<1x!tpu.dma_semaphore, #tpu.memory_space<semaphore_mem>> -> memref<!tpu.dma_semaphore, #tpu.memory_space<semaphore_mem>>
    tpu.enqueue_dma source(%73 : memref<128xf32, #tpu.memory_space<any>>) target(%75 : memref<128xf32, #tpu.memory_space<vmem>>) target_semaphore(%77 : memref<!tpu.dma_semaphore, #tpu.memory_space<semaphore_mem>>)
    %c8_i32_40 = arith.constant 8 : i32
    %78 = arith.muli %arg1, %c8_i32_40 : i32
    %c6_i32 = arith.constant 6 : i32
    %79 = arith.addi %78, %c6_i32 : i32
    %80 = arith.index_cast %arg0 : i32 to index
    %81 = arith.index_cast %79 : i32 to index
    %82 = memref.load %arg3[%80, %81] : memref<2x8xi32, #tpu.memory_space<smem>>
    %c0_i32_41 = arith.constant 0 : i32
    %c31_i32_42 = arith.constant 31 : i32
    %83 = arith.maxsi %c0_i32_41, %82 : i32
    %84 = arith.minsi %c31_i32_42, %83 : i32
    %c6_i32_43 = arith.constant 6 : i32
    %c6_i32_44 = arith.constant 6 : i32
    %c0_i32_45 = arith.constant 0 : i32
    %85 = tpu.memref_slice %arg4[%84, %c0_i32_45] : memref<32x128xf32, #tpu.memory_space<any>> -> memref<1x128xf32, #tpu.memory_space<any>>
    %86 = tpu.memref_squeeze %85 : memref<1x128xf32, #tpu.memory_space<any>> -> memref<128xf32, #tpu.memory_space<any>>
    %c0_i32_46 = arith.constant 0 : i32
    %87 = tpu.memref_slice %arg7[%c6_i32_43, %c0_i32_46] : memref<8x128xf32, #tpu.memory_space<vmem>> -> memref<1x128xf32, #tpu.memory_space<vmem>>
    %88 = tpu.memref_squeeze %87 : memref<1x128xf32, #tpu.memory_space<vmem>> -> memref<128xf32, #tpu.memory_space<vmem>>
    %89 = tpu.memref_slice %arg8[%c6_i32_44] : memref<8x!tpu.dma_semaphore, #tpu.memory_space<semaphore_mem>> -> memref<1x!tpu.dma_semaphore, #tpu.memory_space<semaphore_mem>>
    %90 = tpu.memref_squeeze %89 : memref<1x!tpu.dma_semaphore, #tpu.memory_space<semaphore_mem>> -> memref<!tpu.dma_semaphore, #tpu.memory_space<semaphore_mem>>
    tpu.enqueue_dma source(%86 : memref<128xf32, #tpu.memory_space<any>>) target(%88 : memref<128xf32, #tpu.memory_space<vmem>>) target_semaphore(%90 : memref<!tpu.dma_semaphore, #tpu.memory_space<semaphore_mem>>)
    %c8_i32_47 = arith.constant 8 : i32
    %91 = arith.muli %arg1, %c8_i32_47 : i32
    %c7_i32 = arith.constant 7 : i32
    %92 = arith.addi %91, %c7_i32 : i32
    %93 = arith.index_cast %arg0 : i32 to index
    %94 = arith.index_cast %92 : i32 to index
    %95 = memref.load %arg3[%93, %94] : memref<2x8xi32, #tpu.memory_space<smem>>
    %c0_i32_48 = arith.constant 0 : i32
    %c31_i32_49 = arith.constant 31 : i32
    %96 = arith.maxsi %c0_i32_48, %95 : i32
    %97 = arith.minsi %c31_i32_49, %96 : i32
    %c7_i32_50 = arith.constant 7 : i32
    %c7_i32_51 = arith.constant 7 : i32
    %c0_i32_52 = arith.constant 0 : i32
    %98 = tpu.memref_slice %arg4[%97, %c0_i32_52] : memref<32x128xf32, #tpu.memory_space<any>> -> memref<1x128xf32, #tpu.memory_space<any>>
    %99 = tpu.memref_squeeze %98 : memref<1x128xf32, #tpu.memory_space<any>> -> memref<128xf32, #tpu.memory_space<any>>
    %c0_i32_53 = arith.constant 0 : i32
    %100 = tpu.memref_slice %arg7[%c7_i32_50, %c0_i32_53] : memref<8x128xf32, #tpu.memory_space<vmem>> -> memref<1x128xf32, #tpu.memory_space<vmem>>
    %101 = tpu.memref_squeeze %100 : memref<1x128xf32, #tpu.memory_space<vmem>> -> memref<128xf32, #tpu.memory_space<vmem>>
    %102 = tpu.memref_slice %arg8[%c7_i32_51] : memref<8x!tpu.dma_semaphore, #tpu.memory_space<semaphore_mem>> -> memref<1x!tpu.dma_semaphore, #tpu.memory_space<semaphore_mem>>
    %103 = tpu.memref_squeeze %102 : memref<1x!tpu.dma_semaphore, #tpu.memory_space<semaphore_mem>> -> memref<!tpu.dma_semaphore, #tpu.memory_space<semaphore_mem>>
    tpu.enqueue_dma source(%99 : memref<128xf32, #tpu.memory_space<any>>) target(%101 : memref<128xf32, #tpu.memory_space<vmem>>) target_semaphore(%103 : memref<!tpu.dma_semaphore, #tpu.memory_space<semaphore_mem>>)
    %c0_i32_54 = arith.constant 0 : i32
    %c0_i32_55 = arith.constant 0 : i32
    %c0_i32_56 = arith.constant 0 : i32
    %c0_i32_57 = arith.constant 0 : i32
    %104 = tpu.memref_slice %arg4[%c0_i32_54, %c0_i32_57] : memref<32x128xf32, #tpu.memory_space<any>> -> memref<1x128xf32, #tpu.memory_space<any>>
    %105 = tpu.memref_squeeze %104 : memref<1x128xf32, #tpu.memory_space<any>> -> memref<128xf32, #tpu.memory_space<any>>
    %c0_i32_58 = arith.constant 0 : i32
    %106 = tpu.memref_slice %arg7[%c0_i32_55, %c0_i32_58] : memref<8x128xf32, #tpu.memory_space<vmem>> -> memref<1x128xf32, #tpu.memory_space<vmem>>
    %107 = tpu.memref_squeeze %106 : memref<1x128xf32, #tpu.memory_space<vmem>> -> memref<128xf32, #tpu.memory_space<vmem>>
    %108 = tpu.memref_slice %arg8[%c0_i32_56] : memref<8x!tpu.dma_semaphore, #tpu.memory_space<semaphore_mem>> -> memref<1x!tpu.dma_semaphore, #tpu.memory_space<semaphore_mem>>
    %109 = tpu.memref_squeeze %108 : memref<1x!tpu.dma_semaphore, #tpu.memory_space<semaphore_mem>> -> memref<!tpu.dma_semaphore, #tpu.memory_space<semaphore_mem>>
    tpu.wait_dma2 semaphore(%109 : memref<!tpu.dma_semaphore, #tpu.memory_space<semaphore_mem>>) src(%105 : memref<128xf32, #tpu.memory_space<any>>) dst(%107 : memref<128xf32, #tpu.memory_space<vmem>>)
    %c0_i32_59 = arith.constant 0 : i32
    %c1_i32_60 = arith.constant 1 : i32
    %c1_i32_61 = arith.constant 1 : i32
    %c0_i32_62 = arith.constant 0 : i32
    %110 = tpu.memref_slice %arg4[%c0_i32_59, %c0_i32_62] : memref<32x128xf32, #tpu.memory_space<any>> -> memref<1x128xf32, #tpu.memory_space<any>>
    %111 = tpu.memref_squeeze %110 : memref<1x128xf32, #tpu.memory_space<any>> -> memref<128xf32, #tpu.memory_space<any>>
    %c0_i32_63 = arith.constant 0 : i32
    %112 = tpu.memref_slice %arg7[%c1_i32_60, %c0_i32_63] : memref<8x128xf32, #tpu.memory_space<vmem>> -> memref<1x128xf32, #tpu.memory_space<vmem>>
    %113 = tpu.memref_squeeze %112 : memref<1x128xf32, #tpu.memory_space<vmem>> -> memref<128xf32, #tpu.memory_space<vmem>>
    %114 = tpu.memref_slice %arg8[%c1_i32_61] : memref<8x!tpu.dma_semaphore, #tpu.memory_space<semaphore_mem>> -> memref<1x!tpu.dma_semaphore, #tpu.memory_space<semaphore_mem>>
    %115 = tpu.memref_squeeze %114 : memref<1x!tpu.dma_semaphore, #tpu.memory_space<semaphore_mem>> -> memref<!tpu.dma_semaphore, #tpu.memory_space<semaphore_mem>>
    tpu.wait_dma2 semaphore(%115 : memref<!tpu.dma_semaphore, #tpu.memory_space<semaphore_mem>>) src(%111 : memref<128xf32, #tpu.memory_space<any>>) dst(%113 : memref<128xf32, #tpu.memory_space<vmem>>)
    %c0_i32_64 = arith.constant 0 : i32
    %c2_i32_65 = arith.constant 2 : i32
    %c2_i32_66 = arith.constant 2 : i32
    %c0_i32_67 = arith.constant 0 : i32
    %116 = tpu.memref_slice %arg4[%c0_i32_64, %c0_i32_67] : memref<32x128xf32, #tpu.memory_space<any>> -> memref<1x128xf32, #tpu.memory_space<any>>
    %117 = tpu.memref_squeeze %116 : memref<1x128xf32, #tpu.memory_space<any>> -> memref<128xf32, #tpu.memory_space<any>>
    %c0_i32_68 = arith.constant 0 : i32
    %118 = tpu.memref_slice %arg7[%c2_i32_65, %c0_i32_68] : memref<8x128xf32, #tpu.memory_space<vmem>> -> memref<1x128xf32, #tpu.memory_space<vmem>>
    %119 = tpu.memref_squeeze %118 : memref<1x128xf32, #tpu.memory_space<vmem>> -> memref<128xf32, #tpu.memory_space<vmem>>
    %120 = tpu.memref_slice %arg8[%c2_i32_66] : memref<8x!tpu.dma_semaphore, #tpu.memory_space<semaphore_mem>> -> memref<1x!tpu.dma_semaphore, #tpu.memory_space<semaphore_mem>>
    %121 = tpu.memref_squeeze %120 : memref<1x!tpu.dma_semaphore, #tpu.memory_space<semaphore_mem>> -> memref<!tpu.dma_semaphore, #tpu.memory_space<semaphore_mem>>
    tpu.wait_dma2 semaphore(%121 : memref<!tpu.dma_semaphore, #tpu.memory_space<semaphore_mem>>) src(%117 : memref<128xf32, #tpu.memory_space<any>>) dst(%119 : memref<128xf32, #tpu.memory_space<vmem>>)
    %c0_i32_69 = arith.constant 0 : i32
    %c3_i32_70 = arith.constant 3 : i32
    %c3_i32_71 = arith.constant 3 : i32
    %c0_i32_72 = arith.constant 0 : i32
    %122 = tpu.memref_slice %arg4[%c0_i32_69, %c0_i32_72] : memref<32x128xf32, #tpu.memory_space<any>> -> memref<1x128xf32, #tpu.memory_space<any>>
    %123 = tpu.memref_squeeze %122 : memref<1x128xf32, #tpu.memory_space<any>> -> memref<128xf32, #tpu.memory_space<any>>
    %c0_i32_73 = arith.constant 0 : i32
    %124 = tpu.memref_slice %arg7[%c3_i32_70, %c0_i32_73] : memref<8x128xf32, #tpu.memory_space<vmem>> -> memref<1x128xf32, #tpu.memory_space<vmem>>
    %125 = tpu.memref_squeeze %124 : memref<1x128xf32, #tpu.memory_space<vmem>> -> memref<128xf32, #tpu.memory_space<vmem>>
    %126 = tpu.memref_slice %arg8[%c3_i32_71] : memref<8x!tpu.dma_semaphore, #tpu.memory_space<semaphore_mem>> -> memref<1x!tpu.dma_semaphore, #tpu.memory_space<semaphore_mem>>
    %127 = tpu.memref_squeeze %126 : memref<1x!tpu.dma_semaphore, #tpu.memory_space<semaphore_mem>> -> memref<!tpu.dma_semaphore, #tpu.memory_space<semaphore_mem>>
    tpu.wait_dma2 semaphore(%127 : memref<!tpu.dma_semaphore, #tpu.memory_space<semaphore_mem>>) src(%123 : memref<128xf32, #tpu.memory_space<any>>) dst(%125 : memref<128xf32, #tpu.memory_space<vmem>>)
    %c0_i32_74 = arith.constant 0 : i32
    %c4_i32_75 = arith.constant 4 : i32
    %c4_i32_76 = arith.constant 4 : i32
    %c0_i32_77 = arith.constant 0 : i32
    %128 = tpu.memref_slice %arg4[%c0_i32_74, %c0_i32_77] : memref<32x128xf32, #tpu.memory_space<any>> -> memref<1x128xf32, #tpu.memory_space<any>>
    %129 = tpu.memref_squeeze %128 : memref<1x128xf32, #tpu.memory_space<any>> -> memref<128xf32, #tpu.memory_space<any>>
    %c0_i32_78 = arith.constant 0 : i32
    %130 = tpu.memref_slice %arg7[%c4_i32_75, %c0_i32_78] : memref<8x128xf32, #tpu.memory_space<vmem>> -> memref<1x128xf32, #tpu.memory_space<vmem>>
    %131 = tpu.memref_squeeze %130 : memref<1x128xf32, #tpu.memory_space<vmem>> -> memref<128xf32, #tpu.memory_space<vmem>>
    %132 = tpu.memref_slice %arg8[%c4_i32_76] : memref<8x!tpu.dma_semaphore, #tpu.memory_space<semaphore_mem>> -> memref<1x!tpu.dma_semaphore, #tpu.memory_space<semaphore_mem>>
    %133 = tpu.memref_squeeze %132 : memref<1x!tpu.dma_semaphore, #tpu.memory_space<semaphore_mem>> -> memref<!tpu.dma_semaphore, #tpu.memory_space<semaphore_mem>>
    tpu.wait_dma2 semaphore(%133 : memref<!tpu.dma_semaphore, #tpu.memory_space<semaphore_mem>>) src(%129 : memref<128xf32, #tpu.memory_space<any>>) dst(%131 : memref<128xf32, #tpu.memory_space<vmem>>)
    %c0_i32_79 = arith.constant 0 : i32
    %c5_i32_80 = arith.constant 5 : i32
    %c5_i32_81 = arith.constant 5 : i32
    %c0_i32_82 = arith.constant 0 : i32
    %134 = tpu.memref_slice %arg4[%c0_i32_79, %c0_i32_82] : memref<32x128xf32, #tpu.memory_space<any>> -> memref<1x128xf32, #tpu.memory_space<any>>
    %135 = tpu.memref_squeeze %134 : memref<1x128xf32, #tpu.memory_space<any>> -> memref<128xf32, #tpu.memory_space<any>>
    %c0_i32_83 = arith.constant 0 : i32
    %136 = tpu.memref_slice %arg7[%c5_i32_80, %c0_i32_83] : memref<8x128xf32, #tpu.memory_space<vmem>> -> memref<1x128xf32, #tpu.memory_space<vmem>>
    %137 = tpu.memref_squeeze %136 : memref<1x128xf32, #tpu.memory_space<vmem>> -> memref<128xf32, #tpu.memory_space<vmem>>
    %138 = tpu.memref_slice %arg8[%c5_i32_81] : memref<8x!tpu.dma_semaphore, #tpu.memory_space<semaphore_mem>> -> memref<1x!tpu.dma_semaphore, #tpu.memory_space<semaphore_mem>>
    %139 = tpu.memref_squeeze %138 : memref<1x!tpu.dma_semaphore, #tpu.memory_space<semaphore_mem>> -> memref<!tpu.dma_semaphore, #tpu.memory_space<semaphore_mem>>
    tpu.wait_dma2 semaphore(%139 : memref<!tpu.dma_semaphore, #tpu.memory_space<semaphore_mem>>) src(%135 : memref<128xf32, #tpu.memory_space<any>>) dst(%137 : memref<128xf32, #tpu.memory_space<vmem>>)
    %c0_i32_84 = arith.constant 0 : i32
    %c6_i32_85 = arith.constant 6 : i32
    %c6_i32_86 = arith.constant 6 : i32
    %c0_i32_87 = arith.constant 0 : i32
    %140 = tpu.memref_slice %arg4[%c0_i32_84, %c0_i32_87] : memref<32x128xf32, #tpu.memory_space<any>> -> memref<1x128xf32, #tpu.memory_space<any>>
    %141 = tpu.memref_squeeze %140 : memref<1x128xf32, #tpu.memory_space<any>> -> memref<128xf32, #tpu.memory_space<any>>
    %c0_i32_88 = arith.constant 0 : i32
    %142 = tpu.memref_slice %arg7[%c6_i32_85, %c0_i32_88] : memref<8x128xf32, #tpu.memory_space<vmem>> -> memref<1x128xf32, #tpu.memory_space<vmem>>
    %143 = tpu.memref_squeeze %142 : memref<1x128xf32, #tpu.memory_space<vmem>> -> memref<128xf32, #tpu.memory_space<vmem>>
    %144 = tpu.memref_slice %arg8[%c6_i32_86] : memref<8x!tpu.dma_semaphore, #tpu.memory_space<semaphore_mem>> -> memref<1x!tpu.dma_semaphore, #tpu.memory_space<semaphore_mem>>
    %145 = tpu.memref_squeeze %144 : memref<1x!tpu.dma_semaphore, #tpu.memory_space<semaphore_mem>> -> memref<!tpu.dma_semaphore, #tpu.memory_space<semaphore_mem>>
    tpu.wait_dma2 semaphore(%145 : memref<!tpu.dma_semaphore, #tpu.memory_space<semaphore_mem>>) src(%141 : memref<128xf32, #tpu.memory_space<any>>) dst(%143 : memref<128xf32, #tpu.memory_space<vmem>>)
    %c0_i32_89 = arith.constant 0 : i32
    %c7_i32_90 = arith.constant 7 : i32
    %c7_i32_91 = arith.constant 7 : i32
    %c0_i32_92 = arith.constant 0 : i32
    %146 = tpu.memref_slice %arg4[%c0_i32_89, %c0_i32_92] : memref<32x128xf32, #tpu.memory_space<any>> -> memref<1x128xf32, #tpu.memory_space<any>>
    %147 = tpu.memref_squeeze %146 : memref<1x128xf32, #tpu.memory_space<any>> -> memref<128xf32, #tpu.memory_space<any>>
    %c0_i32_93 = arith.constant 0 : i32
    %148 = tpu.memref_slice %arg7[%c7_i32_90, %c0_i32_93] : memref<8x128xf32, #tpu.memory_space<vmem>> -> memref<1x128xf32, #tpu.memory_space<vmem>>
    %149 = tpu.memref_squeeze %148 : memref<1x128xf32, #tpu.memory_space<vmem>> -> memref<128xf32, #tpu.memory_space<vmem>>
    %150 = tpu.memref_slice %arg8[%c7_i32_91] : memref<8x!tpu.dma_semaphore, #tpu.memory_space<semaphore_mem>> -> memref<1x!tpu.dma_semaphore, #tpu.memory_space<semaphore_mem>>
    %151 = tpu.memref_squeeze %150 : memref<1x!tpu.dma_semaphore, #tpu.memory_space<semaphore_mem>> -> memref<!tpu.dma_semaphore, #tpu.memory_space<semaphore_mem>>
    tpu.wait_dma2 semaphore(%151 : memref<!tpu.dma_semaphore, #tpu.memory_space<semaphore_mem>>) src(%147 : memref<128xf32, #tpu.memory_space<any>>) dst(%149 : memref<128xf32, #tpu.memory_space<vmem>>)
    %c0 = arith.constant 0 : index
    %c0_94 = arith.constant 0 : index
    %152 = vector.load %arg7[%c0, %c0_94] : memref<8x128xf32, #tpu.memory_space<vmem>>, vector<8x128xf32>
    %c0_95 = arith.constant 0 : index
    %c0_96 = arith.constant 0 : index
    %153 = vector.load %arg5[%c0_95, %c0_96] : memref<8x128xf32, #tpu.memory_space<vmem>>, vector<8x128xf32>
    %154 = arith.addf %152, %153 : vector<8x128xf32>
    %c0_97 = arith.constant 0 : index
    %155 = memref.load %arg2[%c0_97] : memref<1xi32, #tpu.memory_space<smem>>
    %c8_i32_98 = arith.constant 8 : i32
    %156 = arith.muli %arg0, %c8_i32_98 : i32
    %c8_i32_99 = arith.constant 8 : i32
    %157 = arith.muli %arg1, %c8_i32_99 : i32
    %158 = arith.addi %156, %157 : i32
    %159 = tpu.iota {dimensions = array<i32: 0>} : vector<8x128xi32>
    %160 = vector.broadcast %158 : i32 to vector<8x128xi32>
    %161 = arith.addi %160, %159 : vector<8x128xi32>
    %162 = tpu.iota {dimensions = array<i32: 1>} : vector<8x128xi32>
    %c128_i32 = arith.constant 128 : i32
    %163 = vector.broadcast %c128_i32 : i32 to vector<8x128xi32>
    %164 = arith.muli %161, %163 : vector<8x128xi32>
    %165 = arith.addi %164, %162 : vector<8x128xi32>
    %c-1640531527_i32 = arith.constant -1640531527 : i32
    %166 = vector.broadcast %c-1640531527_i32 : i32 to vector<8x128xi32>
    %167 = arith.muli %165, %166 : vector<8x128xi32>
    %c-2048144789_i32 = arith.constant -2048144789 : i32
    %168 = arith.muli %155, %c-2048144789_i32 : i32
    %169 = vector.broadcast %168 : i32 to vector<8x128xi32>
    %170 = arith.addi %167, %169 : vector<8x128xi32>
    %c16_i32 = arith.constant 16 : i32
    %171 = vector.broadcast %c16_i32 : i32 to vector<8x128xi32>
    %172 = arith.shrui %170, %171 : vector<8x128xi32>
    %173 = arith.xori %170, %172 : vector<8x128xi32>
    %c2146121005_i32 = arith.constant 2146121005 : i32
    %174 = vector.broadcast %c2146121005_i32 : i32 to vector<8x128xi32>
    %175 = arith.muli %173, %174 : vector<8x128xi32>
    %c15_i32 = arith.constant 15 : i32
    %176 = vector.broadcast %c15_i32 : i32 to vector<8x128xi32>
    %177 = arith.shrui %175, %176 : vector<8x128xi32>
    %178 = arith.xori %175, %177 : vector<8x128xi32>
    %c-2073254261_i32 = arith.constant -2073254261 : i32
    %179 = vector.broadcast %c-2073254261_i32 : i32 to vector<8x128xi32>
    %180 = arith.muli %178, %179 : vector<8x128xi32>
    %c16_i32_100 = arith.constant 16 : i32
    %181 = vector.broadcast %c16_i32_100 : i32 to vector<8x128xi32>
    %182 = arith.shrui %180, %181 : vector<8x128xi32>
    %183 = arith.xori %180, %182 : vector<8x128xi32>
    %c8_i32_101 = arith.constant 8 : i32
    %184 = vector.broadcast %c8_i32_101 : i32 to vector<8x128xi32>
    %185 = arith.shrui %183, %184 : vector<8x128xi32>
    %c1677721_i32 = arith.constant 1677721 : i32
    %186 = vector.broadcast %c1677721_i32 : i32 to vector<8x128xi32>
    %187 = arith.cmpi uge, %185, %186 : vector<8x128xi32>
    %cst = arith.constant 1.11111116 : f32
    %188 = vector.broadcast %cst : f32 to vector<8x128xf32>
    %189 = arith.mulf %154, %188 : vector<8x128xf32>
    %cst_102 = arith.constant 0.000000e+00 : f32
    %190 = vector.broadcast %cst_102 : f32 to vector<8x128xf32>
    %191 = arith.select %187, %189, %190 : vector<8x128xi1>, vector<8x128xf32>
    %c0_103 = arith.constant 0 : index
    %c0_104 = arith.constant 0 : index
    %c0_105 = arith.constant 0 : index
    %192 = vector.load %arg6[%c0_103, %c0_104, %c0_105] : memref<1x8x128xf32, #tpu.memory_space<vmem>>, vector<1x8x128xf32>
    %193 = vector.shape_cast %192 : vector<1x8x128xf32> to vector<8x128xf32>
    %194 = vector.shape_cast %191 : vector<8x128xf32> to vector<1x8x128xf32>
    tpu.vector_store %arg6[%c0_103, %c0_104, %c0_105], %194 {strides = array<i32>} : memref<1x8x128xf32, #tpu.memory_space<vmem>>, vector<1x8x128xf32>,
    return
  }
  func.func @transform_1(%arg0: i32, %arg1: i32, %arg2: memref<1xi32, #tpu.memory_space<smem>>, %arg3: memref<2x8xi32, #tpu.memory_space<smem>>) -> (i32, i32) {
    %c0_i32 = arith.constant 0 : i32
    %c0_i32_0 = arith.constant 0 : i32
    return %arg1, %c0_i32 : i32, i32
  }
  func.func @transform_2(%arg0: i32, %arg1: i32, %arg2: memref<1xi32, #tpu.memory_space<smem>>, %arg3: memref<2x8xi32, #tpu.memory_space<smem>>) -> (i32, i32, i32) {
    %c0_i32 = arith.constant 0 : i32
    %c0_i32_0 = arith.constant 0 : i32
    return %arg0, %arg1, %c0_i32 : i32, i32, i32
  }
}

</mosaic_0001>

<bundles_post_ra>
// kernel: tpu_custom_call.1
= control target key start
LH: loop header
LB: loop body
LE: loop exit
PB: predicated region body
PF: predicated region fallthrough
CT: control target
= control target key end

     0   :  { %s1381_s0 = inlined_call_operand.<no memory space> [shape: s32[1], index: 0, kind: input, shape index: {}]   ;;  %s1382_s1 = inlined_call_operand.vmem [shape: s32[2,8], index: 1, kind: input, shape index: {}]   ;;  %s1383_s2 = inlined_call_operand.hbm [shape: f32[32,128], index: 2, kind: input, shape index: {}]   ;;  %s1384_s3 = inlined_call_operand.hbm [shape: f32[8,128], index: 3, kind: input, shape index: {}]   ;;  %s1385_s4 = inlined_call_operand.hbm [shape: f32[2,8,128], index: 4, kind: output, shape index: {}]  }
   0x1   :  { %1389 = sst [smem:[#allocation42_spill]] %s1384_s3  ;;  %s10_s19 = sshll.u32 %s1382_s1, 4  ;;  %s11_s19 = int_to_ptr.vmem [resolvable:$true] %s10_s19 }
   0x2   :  { %9 = sst [smem:[#allocation5]] %s1381_s0  ;;  %s731_s20 = scalar_lea.vmem %s11_s19, 32 }
   0x3   :  { %p732_p0 = scmp.ne.s32.totalorder %s11_s19, %s731_s20  ;;  %p736_p1 = scmp.lt.s32.totalorder %s11_s19, %s11_s19 }
   0x4   :  { %p737_p2 = scmp.lt.s32.totalorder %s731_s20, %s731_s20 }
   0x6   :  { %p738_p3 = por %p737_p2, %p736_p1 }
   0x8   :  { %p739_p4 = pnand %p738_p3, %p732_p0 }
   0xa   :  { %742 = shalt.err (!%p739_p4)  }
   0xb   :  { %s1045_s21 = smov [#allocation6]  }
   0xc   :  { %13 = dma.vmem_to_smem %s11_s19, 32, %s1045_s21, [#allocation4] }
   0xd   :  { %995 = dma.done.wait [#allocation4], 32 }
   0xe   :  { %996 = vsyncadd [#allocation4], 4294967264 }
   0xf   :  { %15 = sfence }
  0x10   :  { %16 = vsyncpa [#allocation8], 0 }
  0x11   :  { %17 = vsyncpa [#allocation9], 0 }
  0x12   :  { %19 = vsyncpa [#allocation9 + $0x1], 0  ;;  %s1087_s0 = smov 0   ;;  %s1089_s22 = smov 0  }
  0x13   :  { %s1091_s1 = smov 0   ;;  %s1093_s23 = smov 0  }
  0x14   :  { %s1095_s24 = smov 0   ;;  %s1097_s25 = smov 0  }
  0x15 LB: > { %1390 = sst [smem:[#allocation40_spill]] %s1039_s24  ;;  %s564_s26 = sadd.s32 4294967295, %s1043_s25   ;;  %s1043_s25 = sphi %s1097_s25, %s25_s25   ;;  %s1039_s24 = sphi %s1095_s24, %s1401_s24   ;;  %s1035_s23 = sphi %s1093_s23, %s1400_s23   ;;  %s1031_s1 = sphi %s1091_s1, %s1404_s1   ;;  %s1027_s22 = sphi %s1089_s22, %s1403_s22   ;;  %s1023_s0 = sphi %s1087_s0, %s1402_s0  }
  0x16   : > { %s565_s27 = sadd.s32 4294967294, %s1043_s25   ;;  %s37_s28 = sadd.s32 1, %s1039_s24 }
  0x17   : > { %s72_s29 = sadd.s32 1, %s1031_s1  ;;  %p39_p5 = scmp.ge.s32.totalorder %s37_s28, 2 }
  0x18   : > { %p82_p6 = scmp.ne.s32.totalorder %s1031_s1, %s1027_s22  ;;  %p83_p7 = scmp.eq.s32.totalorder %s564_s26, 1 }
  0x19   : > { %p88_p8 = scmp.ne.s32.totalorder %s1027_s22, %s1023_s0  ;;  %s1406_s28 = smov (%p39_p5, %s37_s28), 0 }
  0x1a   : > { %1391 = sst [smem:[#allocation41_spill]] %s1406_s28  ;;  %p1127_p9 = por %p83_p7, %p82_p6 }
  0x1b   : > { %p89_p10 = scmp.eq.s32.totalorder %s565_s27, 1  ;;  %s67_s5 = ssub.s32 %s1039_s24, %s1406_s28 }
  0x1c   : > { %p566_p11 = scmp.ge.s32.totalorder %s1043_s25, 1  ;;  %p70_p12 = scmp.eq.s32.totalorder %s67_s5, 0 }
  0x1d   : > { %p1134_p13 = por %p89_p10, %p88_p8  ;;  %p96_p0 = scmp.lt.s32.totalorder %s1043_s25, 3 }
  0x1e   : > { %s1140_s7 = scalar_select %p70_p12, %s1031_s1, %s72_s29  }
  0x1f   : > { %p1142_p1 = pnand %p566_p11, %p96_p0  ;;  %p1146_p2 = scmp.eq.s32.totalorder %s564_s26, 0 }
  0x20   : > { %s1046_s10 = smov [#allocation7]  }
  0x21   : > { %p662_p3 = pneg %p1142_p1  ;;  %s111_s11 = sshll.u32 %s1046_s10, 4  ;;  %s112_s11 = int_to_ptr.vmem [resolvable:$true] %s111_s11 }
  0x22   : > { %s754_s12 = scalar_lea.vmem %s112_s11, 128  ;;  %p762_p10 = scmp.lt.s32.totalorder %s112_s11, %s112_s11 }
  0x23   : > { %p663_p4 = pnand %p1146_p2, %p662_p3  ;;  %p755_p6 = scmp.ne.s32.totalorder %s112_s11, %s754_s12 }
  0x24   : > { %p763_p11 = scmp.lt.s32.totalorder %s754_s12, %s754_s12 }
  0x25   : > { %p745_p5 = pneg %p663_p4 }
  0x26   : > { %p764_p12 = por %p763_p11, %p762_p10 }
  0x27   : > { %p757_p7 = pnand %p755_p6, %p745_p5 }
  0x29   : > { %p758_p8 = pneg %p757_p7 }
  0x2b   : > { %p765_p0 = pnand %p764_p12, %p758_p8 }
  0x2d   : > { %768 = shalt.err (!%p765_p0)
}
  0x2e   : > { %s1396_s3 = sld [smem:[#allocation42_spill]] }
  0x30   : > { %124 = sbr.rel (%p1142_p1) target bundleno = 310 (0x136), region = 24 }
  0x34   : > { %665 = dma.hbm_to_vmem [thread:$0]  (!%p663_p4), %s1396_s3, 128, %s112_s11, [#allocation8]  }
  0x35   : > { %998 = dma.done.wait (%p1146_p2), [#allocation8], 128  }
  0x36   : > { %1000 = vsyncadd (%p1146_p2), [#allocation8], 4294967168  ;;  %s1386_s15 = sand.u32 1, %s1027_s22   ;;  %s1165_s16 = sshll.u32 %s1035_s23, 7 }
  0x37   : > { %s1169_s17 = sshll.u32 %s1386_s15, 3  ;;  %s147_s18 = sld [smem:[#allocation6 + %s1165_s16]] }
  0x38   : > { %s1047_s19 = smov [#allocation2]   ;;  %s172_s21 = sadd.s32 1, %s1165_s16 }
  0x39   : > { %s161_s20 = sshll.u32 %s1047_s19, 4  ;;  %s1175_s26 = sld [smem:[#allocation6 + %s172_s21]]  ;;  %s1173_s20 = int_to_ptr.vmem [resolvable:$true] %s161_s20 }
  0x3a   : > { %s200_s27 = sadd.s32 2, %s1165_s16  ;;  %s1048_s29 = smov [#allocation2 + $0x1]  }
  0x3b   : > { %s189_s5 = sshll.u32 %s1048_s29, 4  ;;  %s1178_s8 = sld [smem:[#allocation6 + %s200_s27]]  ;;  %s1180_s5 = int_to_ptr.vmem [resolvable:$true] %s189_s5 }
  0x3c   : > { %s1193_s27 = scalar_lea.hbm %s1383_s2, 512 }
  0x3d   : > { %p148_p1 = scmp.gt.s32.totalorder %s147_s18, 0  ;;  %p572_p2 = scmp.lt.s32.totalorder %s147_s18, 31 }
  0x3f   : > { %s1408_s18 = smov (!%p148_p1, %s147_s18), 0  ;;  %p174_p3 = scmp.gt.s32.totalorder %s1175_s26, 0 }
  0x40   : > { %p579_p4 = scmp.lt.s32.totalorder %s1175_s26, 31  ;;  %s1410_s18 = smov (!%p572_p2, %s1408_s18), 31 }
  0x41   : > { %s175_s9 = scalar_select %p174_p3, %s1175_s26, 0 }
  0x42   : > { %s577_s10 = sshll.u32 %s1410_s18, 4  ;;  %p202_p5 = scmp.gt.s32.totalorder %s1178_s8, 0 }
  0x43   : > { %s153_s13 = scalar_lea.hbm %s1383_s2, %s577_s10 }
  0x44   : > { %s769_s14 = scalar_lea.hbm %s153_s13, 16  ;;  %p772_p8 = scmp.lt.s32.totalorder %s153_s13, %s1383_s2 }
  0x45   : > { %p770_p7 = scmp.ne.s32.totalorder %s153_s13, %s769_s14  ;;  %p773_p10 = scmp.lt.s32.totalorder %s1193_s27, %s769_s14 }
  0x47   : > { %p774_p11 = por %p773_p10, %p772_p8 }
  0x49   : > { %p775_p12 = pnand %p774_p11, %p770_p7 }
  0x4b   : > { %778 = shalt.err (!%p775_p12)  }
  0x4c   : > { %s779_s18 = scalar_lea.vmem %s1173_s20, 16  ;;  %s1202_s10 = scalar_lea.vmem %s1173_s20, 128 }
  0x4d   : > { %p780_p0 = scmp.ne.s32.totalorder %s1173_s20, %s779_s18  ;;  %p784_p1 = scmp.lt.s32.totalorder %s1173_s20, %s1173_s20 }
  0x4e   : > { %p785_p2 = scmp.lt.s32.totalorder %s1202_s10, %s779_s18 }
  0x50   : > { %p786_p3 = por %p785_p2, %p784_p1 }
  0x52   : > { %p787_p6 = pnand %p786_p3, %p780_p0 }
  0x54   : > { %790 = shalt.err (!%p787_p6)  }
  0x55   : > { %164 = dma.hbm_to_vmem [thread:$0]  %s153_s13, 16, %s1173_s20, [#allocation3] }
  0x56   : > { %s1412_s9 = smov (!%p579_p4, %s175_s9), 31  ;;  %s1049_s12 = smov [#allocation2 + $0x2]  }
  0x57   : > { %s203_s15 = scalar_select %p202_p5, %s1178_s8, 0 }
  0x58   : > { %s584_s11 = sshll.u32 %s1412_s9, 4  ;;  %s217_s14 = sshll.u32 %s1049_s12, 4  ;;  %s1216_s14 = int_to_ptr.vmem [resolvable:$true] %s217_s14 }
  0x59   : > { %s179_s29 = scalar_lea.hbm %s1383_s2, %s584_s11 }
  0x5a   : > { %s791_s18 = scalar_lea.hbm %s179_s29, 16  ;;  %p794_p7 = scmp.lt.s32.totalorder %s179_s29, %s1383_s2 }
  0x5b   : > { %p792_p6 = scmp.ne.s32.totalorder %s179_s29, %s791_s18  ;;  %p795_p8 = scmp.lt.s32.totalorder %s1193_s27, %s791_s18 }
  0x5d   : > { %p796_p10 = por %p795_p8, %p794_p7 }
  0x5f   : > { %p797_p4 = pnand %p796_p10, %p792_p6 }
  0x61   : > { %800 = shalt.err (!%p797_p4)  }
  0x62   : > { %s801_s26 = scalar_lea.vmem %s1180_s5, 16  ;;  %p806_p11 = scmp.lt.s32.totalorder %s1180_s5, %s1173_s20 }
  0x63   : > { %p802_p5 = scmp.ne.s32.totalorder %s1180_s5, %s801_s26  ;;  %p807_p12 = scmp.lt.s32.totalorder %s1202_s10, %s801_s26 }
  0x65   : > { %p808_p0 = por %p807_p12, %p806_p11 }
  0x67   : > { %p809_p1 = pnand %p808_p0, %p802_p5 }
  0x69   : > { %812 = shalt.err (!%p809_p1)  }
  0x6a   : > { %192 = dma.hbm_to_vmem [thread:$0]  %s179_s29, 16, %s1180_s5, [#allocation3 + $0x1] }
  0x6b   : > { %p1397_p2 = scmp.lt.s32.totalorder %s1178_s8, 31  ;;  %s228_s3 = sadd.s32 3, %s1165_s16 }
  0x6c   : > { %s1231_s9 = sld [smem:[#allocation6 + %s228_s3]] }
  0x6d   : > { %s1414_s15 = smov (!%p1397_p2, %s203_s15), 31 }
  0x6e   : > { %s591_s28 = sshll.u32 %s1414_s15, 4 }
  0x6f   : > { %s207_s12 = scalar_lea.hbm %s1383_s2, %s591_s28 }
  0x70   : > { %s813_s19 = scalar_lea.hbm %s207_s12, 16  ;;  %p816_p6 = scmp.lt.s32.totalorder %s207_s12, %s1383_s2 }
  0x71   : > { %p814_p3 = scmp.ne.s32.totalorder %s207_s12, %s813_s19  ;;  %p817_p7 = scmp.lt.s32.totalorder %s1193_s27, %s813_s19 }
  0x73   : > { %p818_p8 = por %p817_p7, %p816_p6 }
  0x75   : > { %p819_p10 = pnand %p818_p8, %p814_p3 }
  0x77   : > { %822 = shalt.err (!%p819_p10)  }
  0x78   : > { %s823_s5 = scalar_lea.vmem %s1216_s14, 16  ;;  %p828_p5 = scmp.lt.s32.totalorder %s1216_s14, %s1173_s20 }
  0x79   : > { %p824_p4 = scmp.ne.s32.totalorder %s1216_s14, %s823_s5  ;;  %p829_p11 = scmp.lt.s32.totalorder %s1202_s10, %s823_s5 }
  0x7b   : > { %p830_p12 = por %p829_p11, %p828_p5 }
  0x7d   : > { %p831_p0 = pnand %p830_p12, %p824_p4 }
  0x7f   : > { %834 = shalt.err (!%p831_p0)  }
  0x80   : > { %220 = dma.hbm_to_vmem [thread:$0]  %s207_s12, 16, %s1216_s14, [#allocation3 + $0x2] }
  0x81   : > { %s1050_s8 = smov [#allocation2 + $0x3]   ;;  %s256_s29 = sadd.s32 4, %s1165_s16 }
  0x82   : > { %s245_s15 = sshll.u32 %s1050_s8, 4  ;;  %s1247_s26 = sld [smem:[#allocation6 + %s256_s29]]  ;;  %s246_s15 = int_to_ptr.vmem [resolvable:$true] %s245_s15 }
  0x83   : > { %s1051_s3 = smov [#allocation2 + $0x4]   ;;  %s284_s13 = sadd.s32 5, %s1165_s16 }
  0x84   : > { %s273_s28 = sshll.u32 %s1051_s3, 4  ;;  %p230_p1 = scmp.gt.s32.totalorder %s1231_s9, 0  ;;  %s1255_s28 = int_to_ptr.vmem [resolvable:$true] %s273_s28 }
  0x85   : > { %p593_p2 = scmp.lt.s32.totalorder %s1231_s9, 31  ;;  %s1252_s11 = sld [smem:[#allocation6 + %s284_s13]] }
  0x86   : > { %s1416_s9 = smov (!%p230_p1, %s1231_s9), 0  ;;  %s312_s14 = sadd.s32 6, %s1165_s16 }
  0x87   : > { %s1418_s9 = smov (!%p593_p2, %s1416_s9), 31 }
  0x88   : > { %p258_p3 = scmp.gt.s32.totalorder %s1247_s26, 0  ;;  %s598_s12 = sshll.u32 %s1418_s9, 4 }
  0x89   : > { %s235_s18 = scalar_lea.hbm %s1383_s2, %s598_s12 }
  0x8a   : > { %s835_s5 = scalar_lea.hbm %s235_s18, 16  ;;  %p838_p10 = scmp.lt.s32.totalorder %s235_s18, %s1383_s2 }
  0x8b   : > { %p286_p7 = scmp.gt.s32.totalorder %s1252_s11, 0  ;;  %p836_p8 = scmp.ne.s32.totalorder %s235_s18, %s835_s5 }
  0x8c   : > { %p839_p4 = scmp.lt.s32.totalorder %s1193_s27, %s835_s5 }
  0x8e   : > { %p840_p5 = por %p839_p4, %p838_p10 }
  0x90   : > { %p841_p11 = pnand %p840_p5, %p836_p8 }
  0x92   : > { %844 = shalt.err (!%p841_p11)  }
  0x93   : > { %s845_s3 = scalar_lea.vmem %s246_s15, 16  ;;  %p850_p0 = scmp.lt.s32.totalorder %s246_s15, %s1173_s20 }
  0x94   : > { %p846_p12 = scmp.ne.s32.totalorder %s246_s15, %s845_s3  ;;  %p851_p1 = scmp.lt.s32.totalorder %s1202_s10, %s845_s3 }
  0x96   : > { %p852_p2 = por %p851_p1, %p850_p0 }
  0x98   : > { %p853_p6 = pnand %p852_p2, %p846_p12 }
  0x9a   : > { %856 = shalt.err (!%p853_p6)  }
  0x9b   : > { %248 = dma.hbm_to_vmem [thread:$0]  %s235_s18, 16, %s246_s15, [#allocation3 + $0x3] }
  0x9c   : > { %s259_s9 = scalar_select %p258_p3, %s1247_s26, 0 }
  0x9d   : > { %s287_s13 = scalar_select %p286_p7, %s1252_s11, 0 }
  0x9e   : > { %p1398_p8 = scmp.lt.s32.totalorder %s1247_s26, 31  ;;  %p607_p10 = scmp.lt.s32.totalorder %s1252_s11, 31 }
  0x9f   : > { %s1052_s12 = smov [#allocation2 + $0x5]   ;;  %s1279_s5 = sld [smem:[#allocation6 + %s312_s14]] }
  0xa0   : > { %s1420_s9 = smov (!%p1398_p8, %s259_s9), 31  ;;  %s301_s19 = sshll.u32 %s1052_s12, 4  ;;  %s302_s19 = int_to_ptr.vmem [resolvable:$true] %s301_s19 }
  0xa1   : > { %s605_s21 = sshll.u32 %s1420_s9, 4 }
  0xa2   : > { %s263_s8 = scalar_lea.hbm %s1383_s2, %s605_s21 }
  0xa3   : > { %s857_s29 = scalar_lea.hbm %s263_s8, 16  ;;  %p860_p3 = scmp.lt.s32.totalorder %s263_s8, %s1383_s2 }
  0xa4   : > { %p858_p6 = scmp.ne.s32.totalorder %s263_s8, %s857_s29  ;;  %p861_p4 = scmp.lt.s32.totalorder %s1193_s27, %s857_s29 }
  0xa6   : > { %p862_p7 = por %p861_p4, %p860_p3 }
  0xa8   : > { %p863_p5 = pnand %p862_p7, %p858_p6 }
  0xaa   : > { %866 = shalt.err (!%p863_p5)  }
  0xab   : > { %s867_s26 = scalar_lea.vmem %s1255_s28, 16  ;;  %p872_p12 = scmp.lt.s32.totalorder %s1255_s28, %s1173_s20 }
  0xac   : > { %p868_p11 = scmp.ne.s32.totalorder %s1255_s28, %s867_s26  ;;  %p873_p0 = scmp.lt.s32.totalorder %s1202_s10, %s867_s26 }
  0xae   : > { %p874_p1 = por %p873_p0, %p872_p12 }
  0xb0   : > { %p875_p2 = pnand %p874_p1, %p868_p11 }
  0xb2   : > { %878 = shalt.err (!%p875_p2)  }
  0xb3   : > { %276 = dma.hbm_to_vmem [thread:$0]  %s263_s8, 16, %s1255_s28, [#allocation3 + $0x4] }
  0xb4   : > { %s1422_s13 = smov (!%p607_p10, %s287_s13), 31  ;;  %s1053_s24 = smov [#allocation2 + $0x6]  }
  0xb5   : > { %s329_s14 = sshll.u32 %s1053_s24, 4  ;;  %s612_s9 = sshll.u32 %s1422_s13, 4  ;;  %s330_s14 = int_to_ptr.vmem [resolvable:$true] %s329_s14 }
  0xb6   : > { %s340_s12 = sadd.s32 7, %s1165_s16  ;;  %s291_s18 = scalar_lea.hbm %s1383_s2, %s612_s9 }
  0xb7   : > { %p314_p8 = scmp.gt.s32.totalorder %s1279_s5, 0  ;;  %s879_s29 = scalar_lea.hbm %s291_s18, 16 }
  0xb8   : > { %p880_p6 = scmp.ne.s32.totalorder %s291_s18, %s879_s29  ;;  %p882_p3 = scmp.lt.s32.totalorder %s291_s18, %s1383_s2 }
  0xb9   : > { %p883_p4 = scmp.lt.s32.totalorder %s1193_s27, %s879_s29 }
  0xbb   : > { %p884_p7 = por %p883_p4, %p882_p3 }
  0xbd   : > { %p885_p5 = pnand %p884_p7, %p880_p6 }
  0xbf   : > { %888 = shalt.err (!%p885_p5)  }
  0xc0   : > { %s889_s28 = scalar_lea.vmem %s302_s19, 16  ;;  %p894_p11 = scmp.lt.s32.totalorder %s302_s19, %s1173_s20 }
  0xc1   : > { %p890_p10 = scmp.ne.s32.totalorder %s302_s19, %s889_s28  ;;  %p895_p12 = scmp.lt.s32.totalorder %s1202_s10, %s889_s28 }
  0xc3   : > { %p896_p0 = por %p895_p12, %p894_p11 }
  0xc5   : > { %p897_p1 = pnand %p896_p0, %p890_p10 }
  0xc7   : > { %900 = shalt.err (!%p897_p1)  }
  0xc8   : > { %304 = dma.hbm_to_vmem [thread:$0]  %s291_s18, 16, %s302_s19, [#allocation3 + $0x5] }
  0xc9   : > { %s315_s11 = scalar_select %p314_p8, %s1279_s5, 0 }
  0xca   : > { %p614_p2 = scmp.lt.s32.totalorder %s1279_s5, 31  ;;  %s341_s13 = sld [smem:[#allocation6 + %s340_s12]] }
  0xcc   : > { %s1424_s11 = smov (!%p614_p2, %s315_s11), 31 }
  0xcd   : > { %s619_s8 = sshll.u32 %s1424_s11, 4 }
  0xce   : > { %s319_s21 = scalar_lea.hbm %s1383_s2, %s619_s8 }
  0xcf   : > { %s901_s15 = scalar_lea.hbm %s319_s21, 16  ;;  %p904_p3 = scmp.lt.s32.totalorder %s319_s21, %s1383_s2 }
  0xd0   : > { %p902_p6 = scmp.ne.s32.totalorder %s319_s21, %s901_s15  ;;  %p905_p4 = scmp.lt.s32.totalorder %s1193_s27, %s901_s15 }
  0xd2   : > { %p906_p7 = por %p905_p4, %p904_p3 }
  0xd4   : > { %p907_p5 = pnand %p906_p7, %p902_p6 }
  0xd6   : > { %910 = shalt.err (!%p907_p5)  }
  0xd7   : > { %s911_s19 = scalar_lea.vmem %s330_s14, 16  ;;  %p916_p10 = scmp.lt.s32.totalorder %s330_s14, %s1173_s20 }
  0xd8   : > { %p912_p8 = scmp.ne.s32.totalorder %s330_s14, %s911_s19  ;;  %p917_p11 = scmp.lt.s32.totalorder %s1202_s10, %s911_s19 }
  0xda   : > { %p918_p12 = por %p917_p11, %p916_p10 }
  0xdc   : > { %p919_p0 = pnand %p918_p12, %p912_p8 }
  0xde   : > { %922 = shalt.err (!%p919_p0)  }
  0xdf   : > { %332 = dma.hbm_to_vmem [thread:$0]  %s319_s21, 16, %s330_s14, [#allocation3 + $0x6] }
  0xe0   : > { %p342_p1 = scmp.gt.s32.totalorder %s341_s13, 0  ;;  %p621_p2 = scmp.lt.s32.totalorder %s341_s13, 31 }
  0xe1   : > { %s1054_s5 = smov [#allocation2 + $0x7]  }
  0xe2   : > { %s357_s12 = sshll.u32 %s1054_s5, 4  ;;  %s1426_s13 = smov (!%p342_p1, %s341_s13), 0  ;;  %s358_s12 = int_to_ptr.vmem [resolvable:$true] %s357_s12 }
  0xe3   : > { %s1428_s13 = smov (!%p621_p2, %s1426_s13), 31 }
  0xe4   : > { %s626_s18 = sshll.u32 %s1428_s13, 4 }
  0xe5   : > { %s347_s11 = scalar_lea.hbm %s1383_s2, %s626_s18 }
  0xe6   : > { %s923_s8 = scalar_lea.hbm %s347_s11, 16  ;;  %p926_p3 = scmp.lt.s32.totalorder %s347_s11, %s1383_s2 }
  0xe7   : > { %p924_p6 = scmp.ne.s32.totalorder %s347_s11, %s923_s8  ;;  %p927_p4 = scmp.lt.s32.totalorder %s1193_s27, %s923_s8 }
  0xe9   : > { %p928_p7 = por %p927_p4, %p926_p3 }
  0xeb   : > { %p929_p5 = pnand %p928_p7, %p924_p6 }
  0xed   : > { %932 = shalt.err (!%p929_p5)  }
  0xee   : > { %s933_s14 = scalar_lea.vmem %s358_s12, 16  ;;  %p938_p10 = scmp.lt.s32.totalorder %s358_s12, %s1173_s20 }
  0xef   : > { %p934_p8 = scmp.ne.s32.totalorder %s358_s12, %s933_s14  ;;  %p939_p11 = scmp.lt.s32.totalorder %s1202_s10, %s933_s14 }
  0xf1   : > { %p940_p12 = por %p939_p11, %p938_p10 }
  0xf3   : > { %p941_p0 = pnand %p940_p12, %p934_p8 }
  0xf5   : > { %944 = shalt.err (!%p941_p0)  }
  0xf6   : > { %360 = dma.hbm_to_vmem [thread:$0]  %s347_s11, 16, %s358_s12, [#allocation3 + $0x7] }
  0xf7   : > { %s138_s13 = scalar_lea.vmem [#allocation10], %s1169_s17 }
  0xf8   : > { %1001 = dma.done.wait [#allocation3], 16 }
  0xf9   : > { %1002 = vsyncadd [#allocation3], 4294967280 }
  0xfa   : > { %1003 = dma.done.wait [#allocation3 + $0x1], 16 }
  0xfb   : > { %1004 = vsyncadd [#allocation3 + $0x1], 4294967280 }
  0xfc   : > { %1005 = dma.done.wait [#allocation3 + $0x2], 16 }
  0xfd   : > { %1006 = vsyncadd [#allocation3 + $0x2], 4294967280 }
  0xfe   : > { %1007 = dma.done.wait [#allocation3 + $0x3], 16 }
  0xff   : > { %1008 = vsyncadd [#allocation3 + $0x3], 4294967280 }
 0x100   : > { %1009 = dma.done.wait [#allocation3 + $0x4], 16 }
 0x101   : > { %1010 = vsyncadd [#allocation3 + $0x4], 4294967280 }
 0x102   : > { %1011 = dma.done.wait [#allocation3 + $0x5], 16 }
 0x103   : > { %1012 = vsyncadd [#allocation3 + $0x5], 4294967280 }
 0x104   : > { %1013 = dma.done.wait [#allocation3 + $0x6], 16 }
 0x105   : > { %1014 = vsyncadd [#allocation3 + $0x6], 4294967280 }
 0x106   : > { %1015 = dma.done.wait [#allocation3 + $0x7], 16 }
 0x107   : > { %1016 = vsyncadd [#allocation3 + $0x7], 4294967280  ;;  %s627_s20 = sshll.u32 %s1035_s23, 3  ;;  %v383_v0 = vlaneseq  ;;  %s380_s27 = sld [smem:[#allocation5]]  ;;  %v377_v14 = vld [vmem:[#allocation2] sm:$0xff]  ;;  %v378_v15 = vld [vmem:[#allocation7] sm:$0xff] }
 0x108   : > { %v385_v1 = vstv %s627_s20  ;;  %v379_v18 = vadd.f32 %v378_v15, %v377_v14  ;;  %s423_s23 = sshll.u32 %s138_s13, 4  ;;  %s1337_s29 = scalar_lea.hbm %s1385_s4, %s1165_s16  ;;  %s424_s23 = int_to_ptr.vmem [resolvable:$true] %s423_s23 }
 0x109   : > { %v384_v2 = vshrl.u32 %v383_v0, 7  ;;  %v388_v4 = vand.u32 127, %v383_v0  ;;  %s1399_s3 = sand.u32 1, %s1027_s22   ;;  %s945_s5 = scalar_lea.vmem %s424_s23, 128 }
 0x10a   : > { %v405_v21 = vmul.f32 1.1111112, %v379_v18  ;;  %s409_s19 = scalar_lea.sflag [#allocation9], %s1399_s3  ;;  %p946_p1 = scmp.ne.s32.totalorder %s424_s23, %s945_s5 }
 0x10b   : > { %v386_v3 = vadd.s32 %v385_v1, %v384_v2  ;;  %s1055_s12 = smov [#allocation10]  }
 0x10c   : > { %p947_p2 = pnand %p946_p1, %p1127_p9  ;;  %s949_s18 = sshll.u32 %s1055_s12, 4  ;;  %s950_s18 = int_to_ptr.vmem [resolvable:$false] %s949_s18 }
 0x10d   : > { %v389_v5 = vmul.u32 128, %v386_v3  ;;  %s392_s10 = smul.u32 2246822507, %s380_s27  ;;  %s951_s26 = scalar_lea.vmem %s950_s18, 256 }
 0x10e   : > { %p948_p6 = pneg %p947_p2  ;;  %p952_p3 = scmp.lt.s32.totalorder %s424_s23, %s950_s18 }
 0x10f   : > { %v390_v6 = vadd.s32 %v389_v5, %v388_v4  ;;  %v393_v7 = vstv %s392_s10  ;;  %p953_p4 = scmp.lt.s32.totalorder %s951_s26, %s945_s5 }
 0x111   : > { %v391_v8 = vmul.u32 2654435769, %v390_v6  ;;  %p954_p7 = por %p953_p4, %p952_p3 }
 0x113   : > { %v394_v9 = vadd.s32 %v393_v7, %v391_v8  ;;  %p955_p5 = pnand %p954_p7, %p948_p6 }
 0x115   : > { %v395_v10 = vshrl.u32 %v394_v9, 16 }
 0x117   : > { %v396_v11 = vxor.u32 %v395_v10, %v394_v9 }
 0x119   : > { %v397_v12 = vmul.u32 2146121005, %v396_v11 }
 0x11b   : > { %v398_v13 = vshrl.u32 %v397_v12, 15 }
 0x11d   : > { %v399_v16 = vxor.u32 %v398_v13, %v397_v12 }
 0x11f   : > { %v400_v17 = vmul.u32 2221713035, %v399_v16 }
 0x121   : > { %v401_v19 = vshrl.u32 %v400_v17, 16 }
 0x123   : > { %v402_v20 = vxor.u32 %v401_v19, %v400_v17 }
 0x125   : > { %v403_v22 = vshrl.u32 %v402_v20, 8 }
 0x127   : > { %vm404_vm0 = vcmp.ge.u32.totalorder %v403_v22, 1677721 }
 0x128   : > { %v406_v23 = vsel %vm404_vm0, %v405_v21, 0.0 }
 0x129   : > { %407 = vst [vmem:[%s138_s13] sm:$0xff] %v406_v23 }
 0x12a   : > { %958 = shalt.err (!%p955_p5)
}
 0x12b   : > { %s959_s16 = scalar_lea.hbm %s1337_s29, 128  ;;  %s963_s11 = scalar_lea.hbm %s1385_s4, 256 }
 0x12c   : > { %p960_p8 = scmp.ne.s32.totalorder %s1337_s29, %s959_s16  ;;  %p964_p12 = scmp.lt.s32.totalorder %s1337_s29, %s1385_s4 }
 0x12d   : > { %p965_p0 = scmp.lt.s32.totalorder %s963_s11, %s959_s16 }
 0x12e   : > { %p961_p10 = pnand %p960_p8, %p1127_p9 }
 0x12f   : > { %p966_p1 = por %p965_p0, %p964_p12 }
 0x130   : > { %p962_p11 = pneg %p961_p10 }
 0x132   : > { %p967_p2 = pnand %p966_p1, %p962_p11 }
 0x134   : > { %970 = shalt.err (!%p967_p2)
}
 0x135   : > { %660 = dma.vmem_to_hbm [thread:$0]  (%p1127_p9), %s424_s23, 128, %s1337_s29, %s409_s19  }
 0x136 PF: > { %p672_p6 = scmp.ge.s32.totalorder %s1043_s25, 2  ;;  %s435_s9 = sand.u32 1, %s1023_s0  }
 0x137   : > { %s436_s14 = scalar_lea.sflag [#allocation9], %s435_s9 }
 0x138   : > { %p667_p3 = pnand %p672_p6, %p1134_p13 }
 0x13a   : > { %p668_p4 = pneg %p667_p3 }
 0x13c   : > { %1018 = dma.done.wait (%p668_p4), %s436_s14, 128  }
 0x13d   : > { %1020 = vsyncadd (%p668_p4), %s436_s14, 4294967168  ;;  %s25_s25 = sadd.s32 1, %s1043_s25   ;;  %s1400_s23 = sld [smem:[#allocation40_spill]] }
 0x13e   : > { %p22_p7 = scmp.ge.s32.totalorder %s25_s25, 4   ;;  %s1401_s24 = sld [smem:[#allocation41_spill]] }
 0x13f   : > { %s1402_s0 = smov %s1027_s22  ;;  %s1403_s22 = smov %s1031_s1 }
 0x140   : > { %s1404_s1 = smov %s1140_s7  ;;  %24 = sbr.rel (!%p22_p7) target bundleno = 21 (0x15), region = 123 }
 0x145   :  { %441 = vsyncpa [#allocation8], 1 }
 0x146   :  { %443 = vsyncpa [#allocation8 + $0x1], 1 }
 0x147   :  { %444 = vsyncpa [#allocation9], 1 }
 0x148   :  { %446 = vsyncpa [#allocation9 + $0x1], 1 }
 0x149   :  { %447 = vsyncmov [#allocation3] }
 0x14c   :  { %s448_s30 = vpop.sfrf %447 }
 0x14d   :  { %p632_p9 = scmp.ne.s32.totalorder %s448_s30, 0 }
 0x14f   :  { %452 = shalt.err (%p632_p9)  }
 0x150   :  { %454 = vsyncmov [#allocation3 + $0x1] }
 0x153   :  { %s455_s6 = vpop.sfrf %454 }
 0x154   :  { %p633_p13 = scmp.ne.s32.totalorder %s455_s6, 0 }
 0x156   :  { %459 = shalt.err (%p633_p13)  }
 0x157   :  { %461 = vsyncmov [#allocation3 + $0x2] }
 0x15a   :  { %s462_s7 = vpop.sfrf %461 }
 0x15b   :  { %p634_p5 = scmp.ne.s32.totalorder %s462_s7, 0 }
 0x15d   :  { %466 = shalt.err (%p634_p5)  }
 0x15e   :  { %468 = vsyncmov [#allocation3 + $0x3] }
 0x161   :  { %s469_s13 = vpop.sfrf %468 }
 0x162   :  { %p635_p8 = scmp.ne.s32.totalorder %s469_s13, 0 }
 0x164   :  { %473 = shalt.err (%p635_p8)  }
 0x165   :  { %475 = vsyncmov [#allocation3 + $0x4] }
 0x168   :  { %s476_s2 = vpop.sfrf %475 }
 0x169   :  { %p636_p10 = scmp.ne.s32.totalorder %s476_s2, 0 }
 0x16b   :  { %480 = shalt.err (%p636_p10)  }
 0x16c   :  { %482 = vsyncmov [#allocation3 + $0x5] }
 0x16f   :  { %s483_s4 = vpop.sfrf %482 }
 0x170   :  { %p637_p11 = scmp.ne.s32.totalorder %s483_s4, 0 }
 0x172   :  { %487 = shalt.err (%p637_p11)  }
 0x173   :  { %489 = vsyncmov [#allocation3 + $0x6] }
 0x176   :  { %s490_s0 = vpop.sfrf %489 }
 0x177   :  { %p638_p12 = scmp.ne.s32.totalorder %s490_s0, 0 }
 0x179   :  { %494 = shalt.err (%p638_p12)  }
 0x17a   :  { %496 = vsyncmov [#allocation3 + $0x7] }
 0x17d   :  { %s497_s22 = vpop.sfrf %496 }
 0x17e   :  { %p639_p0 = scmp.ne.s32.totalorder %s497_s22, 0 }
 0x180   :  { %501 = shalt.err (%p639_p0)  }

</bundles_post_ra>
